<compile_context>
chip_gen: v5e
topology: v5e:2x2
jax: 0.10.0
libtpu: 0.0.40
codegen_flags: <defaults>
</compile_context>

<pallas_src>
import jax
import jax.numpy as jnp
from jax import lax
from jax.experimental import pallas as pl
from jax.experimental.pallas import tpu as pltpu


def _round_up(x, n):
    return ((x + n - 1) // n) * n


# ---------------------------------------------------------------------------
# Pass 1: x_msg = rsqrt(col_degree) * relu(x @ W^T + b)        (n_cols, P)
# ---------------------------------------------------------------------------
def msg_kernel(x_ref, w_ref, b_ref, cdeg_ref, xm_ref):
    x = x_ref[...]                       # (tq, in_dim)  f32
    w = w_ref[...]                       # (in_dim, P)   f32
    b = b_ref[...]                       # (1, P)        f32
    cdeg = cdeg_ref[...]                 # (tq, 1)       f32

    x_msg = jnp.dot(x, w, preferred_element_type=jnp.float32) + b
    x_msg = jnp.maximum(x_msg, 0.0)      # ReLU; dropout(p=0.0) is the identity
    # Keep VPU/EUP math in f32 (v5e has no bf16 VPU/EUP); cast only on store.
    col_scale = jnp.where(cdeg > 0.0, lax.rsqrt(cdeg), 0.0)
    xm_ref[...] = (col_scale * x_msg).astype(xm_ref.dtype)


# ---------------------------------------------------------------------------
# Pass 2: out = rsqrt(row_degree) * (m @ x_msg)
#   grid = (row tiles [parallel], reduction tiles along columns [arbitrary])
#   - row degree accumulated in a (tm, 1) VMEM scratch across k
#   - accumulate directly into the output block (no acc scratch)
#   - x_msg either VMEM-resident (sliced by k) or streamed per k-tile
# ---------------------------------------------------------------------------
def _make_agg_kernel(tk, xm_is_resident):
    def agg_kernel(m_ref, xm_ref, o_ref, rdeg_ref):
        k = pl.program_id(1)

        @pl.when(k == 0)
        def _():
            o_ref[...] = jnp.zeros_like(o_ref)
            rdeg_ref[...] = jnp.zeros_like(rdeg_ref)

        m_tile = m_ref[...]              # (tm, tk) agg_dtype (bf16 by default)

        # Row-degree partial sum: XLU reduce, f32 accumulation, hides under DMA.
        rdeg_ref[...] += jnp.sum(m_tile.astype(jnp.float32), axis=1,
                                 keepdims=True)

        if xm_is_resident:
            start = pl.multiple_of(k * tk, 256)
            xm_tile = xm_ref[pl.ds(start, tk), :]        # (tk, P)
        else:
            xm_tile = xm_ref[...]                        # (tk, P)

        o_ref[...] += jnp.dot(m_tile, xm_tile,
                              preferred_element_type=jnp.float32)

        @pl.when(k == pl.num_programs(1) - 1)
        def _():
            rdeg = rdeg_ref[...]         # (tm, 1)
            row_scale = jnp.where(rdeg > 0.0, lax.rsqrt(rdeg), 0.0)
            o_ref[...] = row_scale * o_ref[...]
    return agg_kernel


def gcn_forward(x, w, b, m, *, tm=512, tk=1024, agg_dtype=jnp.bfloat16,
                xm_resident=None):
    """GCN forward.

    x: (N, in_dim), w: (out_dim, in_dim) torch layout, b: (out_dim,),
    m: (N, N) adjacency-like.  Returns (N, out_dim) float32.

    agg_dtype: dtype m / x_msg are streamed in for the aggregation matmul
    (bf16 by default; pass jnp.float32 for bit-level agreement with the
    reference).  Accumulation is always f32.
    """
    N, in_dim = x.shape
    out_dim = w.shape[0]
    f32 = jnp.float32

    # MXU-aligned tiles (multiples of 256), clamped for small problems.
    nbase = _round_up(N, 256)
    tm = min(_round_up(tm, 256), nbase)
    tk = min(_round_up(tk, 256), nbase)
    # Independent row/col padding of m (no lcm blow-up).
    n_rows = _round_up(N, tm)
    n_cols = _round_up(N, tk)
    p = _round_up(out_dim, 128)          # lane-dense output width
    tq = 256                             # pass-1 row tile (divides n_cols)

    # ---- m handling: at most one fused pad+cast copy -----------------------
    if m.shape == (n_rows, n_cols) and m.dtype == agg_dtype:
        m_p = m                          # zero wrapper copies
    else:
        m_p = jnp.zeros((n_rows, n_cols), agg_dtype).at[:N, :N].set(
            m.astype(agg_dtype))

    # Column degree must be known before pass 1 (it scales x_msg), so this is
    # the one unavoidable extra pass over m; read the (smaller) agg-dtype copy
    # and accumulate in f32.  Padded columns sum to 0 -> guarded rsqrt -> 0.
    cdeg = jnp.sum(m_p, axis=0, dtype=f32).reshape(n_cols, 1)

    # Small O(N * in_dim) / O(in_dim * out_dim) operands: plain padded copies.
    x_p = jnp.zeros((n_cols, in_dim), f32).at[:N, :].set(x.astype(f32))
    w_p = jnp.zeros((in_dim, p), f32).at[:, :out_dim].set(w.T.astype(f32))
    b_p = jnp.zeros((1, p), f32).at[0, :out_dim].set(b.astype(f32))

    vmem_cap = 48 * 1024 * 1024          # within v7x's 64 MiB, fine elsewhere

    # ---- pass 1: message transform (grid over node tiles) ------------------
    xm = pl.pallas_call(
        msg_kernel,
        out_shape=jax.ShapeDtypeStruct((n_cols, p), agg_dtype),
        grid=(n_cols // tq,),
        in_specs=[
            pl.BlockSpec((tq, in_dim), lambda i: (i, 0)),   # x
            pl.BlockSpec((in_dim, p), lambda i: (0, 0)),    # W^T (padded)
            pl.BlockSpec((1, p), lambda i: (0, 0)),         # bias
            pl.BlockSpec((tq, 1), lambda i: (i, 0)),        # col degree
        ],
        out_specs=pl.BlockSpec((tq, p), lambda i: (i, 0)),
        compiler_params=pltpu.CompilerParams(
            dimension_semantics=("parallel",),
            vmem_limit_bytes=vmem_cap),
    )(x_p, w_p, b_p, cdeg)

    # ---- pass 2: aggregation ------------------------------------------------
    # Keep x_msg VMEM-resident across the whole grid (constant index map ->
    # fetched once) when its double-buffered footprint is small enough;
    # otherwise stream a (tk, p) tile per reduction step.
    xm_footprint = 2 * n_cols * p * jnp.dtype(agg_dtype).itemsize
    if xm_resident is None:
        xm_resident = xm_footprint <= 8 * 1024 * 1024
    if xm_resident:
        xm_spec = pl.BlockSpec((n_cols, p), lambda i, k: (0, 0))
    else:
        xm_spec = pl.BlockSpec((tk, p), lambda i, k: (k, 0))

    out_p = pl.pallas_call(
        _make_agg_kernel(tk, xm_resident),
        out_shape=jax.ShapeDtypeStruct((n_rows, p), f32),
        grid=(n_rows // tm, n_cols // tk),
        in_specs=[
            pl.BlockSpec((tm, tk), lambda i, k: (i, k)),    # m tile (agg_dtype)
            xm_spec,                                        # scaled x_msg
        ],
        out_specs=pl.BlockSpec((tm, p), lambda i, k: (i, 0)),
        scratch_shapes=[pltpu.VMEM((tm, 1), jnp.float32)],  # row-degree acc
        compiler_params=pltpu.CompilerParams(
            dimension_semantics=("parallel", "arbitrary"),
            vmem_limit_bytes=vmem_cap),
    )(m_p, xm)

    return out_p[:N, :out_dim]


def _reference(x, w, b, m):
    x_msg = jnp.maximum(x @ w.T + b, 0.0)
    row = jnp.sum(m, axis=1, keepdims=True)
    col = jnp.sum(m, axis=0, keepdims=True)
    deg = jnp.sqrt(row) @ jnp.sqrt(col)
    return (m / deg) @ x_msg


if __name__ == "__main__":
    key = jax.random.PRNGKey(0)

    def make_case(key, N, in_dim, out_dim):
        kx, km, kw, kb = jax.random.split(key, 4)
        x = jax.random.normal(kx, (N, in_dim), dtype=jnp.float32)
        # strictly positive adjacency-like matrix -> nonzero degrees
        m = jax.random.uniform(km, (N, N), dtype=jnp.float32,
                               minval=0.1, maxval=1.0)
        bound = 1.0 / (in_dim ** 0.5)
        w = jax.random.uniform(kw, (out_dim, in_dim), dtype=jnp.float32,
                               minval=-bound, maxval=bound)
        b = jax.random.uniform(kb, (out_dim,), dtype=jnp.float32,
                               minval=-bound, maxval=bound)
        return x, w, b, m

    k1, k2 = jax.random.split(key)

    # Small case matching the module's toy shapes; f32 aggregation path for a
    # tight check against the reference (single-tile grid).
    x, w, b, m = make_case(k1, N=16, in_dim=8, out_dim=32)
    out = jax.block_until_ready(gcn_forward(x, w, b, m, agg_dtype=jnp.float32))
    ref = _reference(x, w, b, m)
    assert out.shape == (16, 32)
    assert jnp.allclose(out, ref, atol=1e-4, rtol=1e-4)

    # Larger case: bf16 m / x_msg stream, multi-tile reduction (grid 3x3 after
    # padding N=600 -> 768 with tm=tk=256), in-kernel row-degree accumulation,
    # VMEM-resident x_msg.  bf16 stream -> looser tolerance vs f32 reference.
    x2, w2, b2, m2 = make_case(k2, N=600, in_dim=8, out_dim=32)
    ref2 = _reference(x2, w2, b2, m2)
    out2 = jax.block_until_ready(gcn_forward(x2, w2, b2, m2, tm=256, tk=256))
    assert out2.shape == (600, 32)
    assert jnp.allclose(out2, ref2, atol=2e-2, rtol=2e-2)

    # Same case through the streamed (non-resident) x_msg fallback path.
    out3 = jax.block_until_ready(
        gcn_forward(x2, w2, b2, m2, tm=256, tk=256, xm_resident=False))
    assert out3.shape == (600, 32)
    assert jnp.allclose(out3, ref2, atol=2e-2, rtol=2e-2)

    print("KERNEL_OK")
</pallas_src>

<mosaic_0001>
module attributes {stable_mosaic.version = 11 : i64} {
  func.func @msg_kernel(%arg0: i32, %arg1: memref<256x8xf32, #tpu.memory_space<vmem>>, %arg2: memref<8x128xf32, #tpu.memory_space<vmem>>, %arg3: memref<1x128xf32, #tpu.memory_space<vmem>>, %arg4: memref<256x1xf32, #tpu.memory_space<vmem>>, %arg5: memref<256x128xf32, #tpu.memory_space<vmem>>) attributes {dimension_semantics = [#tpu.dimension_semantics<parallel>], iteration_bounds = array<i64: 1>, scalar_prefetch = 0 : i64, scratch_operands = 0 : i64, tpu.core_type = #tpu.core_type<tc>, window_params = [{transform_indices = @transform_0, window_bounds = array<i64: 256, 8>}, {pipeline_mode = #tpu.pipeline_mode<synchronous>, transform_indices = @transform_1, window_bounds = array<i64: 8, 128>}, {pipeline_mode = #tpu.pipeline_mode<synchronous>, transform_indices = @transform_2, window_bounds = array<i64: 1, 128>}, {transform_indices = @transform_3, window_bounds = array<i64: 256, 1>}, {transform_indices = @transform_4, window_bounds = array<i64: 256, 128>}]} {
    %c0 = arith.constant 0 : index
    %c0_0 = arith.constant 0 : index
    %0 = vector.load %arg1[%c0, %c0_0] : memref<256x8xf32, #tpu.memory_space<vmem>>, vector<256x8xf32>
    %c0_1 = arith.constant 0 : index
    %c0_2 = arith.constant 0 : index
    %1 = vector.load %arg2[%c0_1, %c0_2] : memref<8x128xf32, #tpu.memory_space<vmem>>, vector<8x128xf32>
    %c0_3 = arith.constant 0 : index
    %c0_4 = arith.constant 0 : index
    %2 = vector.load %arg3[%c0_3, %c0_4] : memref<1x128xf32, #tpu.memory_space<vmem>>, vector<1x128xf32>
    %c0_5 = arith.constant 0 : index
    %c0_6 = arith.constant 0 : index
    %3 = vector.load %arg4[%c0_5, %c0_6] : memref<256x1xf32, #tpu.memory_space<vmem>>, vector<256x1xf32>
    %cst = arith.constant dense<0.000000e+00> : vector<256x128xf32>
    %4 = tpu.matmul %0, %1, %cst {dimension_numbers = #tpu.dot_dimension_numbers<[1], [0], [0], [1], [0, 0, 1, 1], [], []>} : vector<256x8xf32>, vector<8x128xf32>, vector<256x128xf32> -> vector<256x128xf32>
    %5 = vector.broadcast %2 : vector<1x128xf32> to vector<256x128xf32>
    %6 = arith.addf %4, %5 : vector<256x128xf32>
    %cst_7 = arith.constant 0.000000e+00 : f32
    %7 = vector.broadcast %cst_7 : f32 to vector<256x128xf32>
    %8 = arith.maximumf %6, %7 : vector<256x128xf32>
    %cst_8 = arith.constant 0.000000e+00 : f32
    %9 = vector.broadcast %cst_8 : f32 to vector<256x1xf32>
    %10 = arith.cmpf ogt, %3, %9 : vector<256x1xf32>
    %11 = math.rsqrt %3 : vector<256x1xf32>
    %cst_9 = arith.constant 0.000000e+00 : f32
    %12 = vector.broadcast %cst_9 : f32 to vector<256x1xf32>
    %13 = arith.select %10, %11, %12 : vector<256x1xi1>, vector<256x1xf32>
    %14 = vector.broadcast %13 : vector<256x1xf32> to vector<256x128xf32>
    %15 = arith.mulf %14, %8 : vector<256x128xf32>
    %c0_10 = arith.constant 0 : index
    %c0_11 = arith.constant 0 : index
    %16 = vector.load %arg5[%c0_10, %c0_11] : memref<256x128xf32, #tpu.memory_space<vmem>>, vector<256x128xf32>
    tpu.vector_store %arg5[%c0_10, %c0_11], %15 {strides = array<i32>} : memref<256x128xf32, #tpu.memory_space<vmem>>, vector<256x128xf32>,
    return
  }
  func.func @transform_0(%arg0: i32) -> (i32, i32) {
    %c0_i32 = arith.constant 0 : i32
    %c0_i32_0 = arith.constant 0 : i32
    return %arg0, %c0_i32 : i32, i32
  }
  func.func @transform_1(%arg0: i32) -> (i32, i32) {
    %c0_i32 = arith.constant 0 : i32
    %c0_i32_0 = arith.constant 0 : i32
    %c0_i32_1 = arith.constant 0 : i32
    return %c0_i32, %c0_i32_0 : i32, i32
  }
  func.func @transform_2(%arg0: i32) -> (i32, i32) {
    %c0_i32 = arith.constant 0 : i32
    %c0_i32_0 = arith.constant 0 : i32
    %c0_i32_1 = arith.constant 0 : i32
    return %c0_i32, %c0_i32_0 : i32, i32
  }
  func.func @transform_3(%arg0: i32) -> (i32, i32) {
    %c0_i32 = arith.constant 0 : i32
    %c0_i32_0 = arith.constant 0 : i32
    return %arg0, %c0_i32 : i32, i32
  }
  func.func @transform_4(%arg0: i32) -> (i32, i32) {
    %c0_i32 = arith.constant 0 : i32
    %c0_i32_0 = arith.constant 0 : i32
    return %arg0, %c0_i32 : i32, i32
  }
}

</mosaic_0001>

<bundles_post_ra>
// kernel: tpu_custom_call.1
= control target key start
LH: loop header
LB: loop body
LE: loop exit
PB: predicated region body
PF: predicated region fallthrough
CT: control target
= control target key end

     0   :  { %vm87_vm0 = vcmask 64512   ;;  %v1088_v5 = vmov 0   ;;  %s2140_s0 = inlined_call_operand.vmem [shape: f32[256,8], index: 0, kind: input, shape index: {}]   ;;  %s2141_s1 = inlined_call_operand.vmem [shape: f32[8,128], index: 1, kind: input, shape index: {}]   ;;  %s2142_s2 = inlined_call_operand.vmem [shape: f32[1,128], index: 2, kind: input, shape index: {}]   ;;  %s2143_s3 = inlined_call_operand.vmem [shape: f32[256,1], index: 3, kind: input, shape index: {}]   ;;  %s2144_s4 = inlined_call_operand.hbm [shape: f32[256,128], index: 4, kind: output, shape index: {}]  }
   0x1   :  { %v50_v0 = vld [vmem:[%s2141_s1] sm:$0xff]  ;;  %996 = vset.pattern.permute.xlu2 %v1088_v5  ;;  %v1143_v7 = vld [vmem:[%s2143_s3 + $0x10] sm:$0xff]  ;;  %995 = vset.pattern.permute.xlu1 %v1088_v5  ;;  %v1156_v9 = vld [vmem:[%s2143_s3 + $0x28] sm:$0xff] }
   0x2   :  { %v18_v1 = vld [vmem:[%s2140_s0] sm:$0xff]  ;;  %199 = vmatpush.msra.mxu0 %v50_v0  ;;  %987 = vmatpush.msra.mxu1 %v50_v0  ;;  %v1161_v10 = vld [vmem:[%s2143_s3 + $0x18] sm:$0xff]  ;;  %v19_v11 = vld [vmem:[%s2140_s0 + $0x8] sm:$0xff]  ;;  %vm387_vm2 = vweird.f32 %v1143_v7  ;;  %vm417_vm5 = vweird.f32 %v1156_v9  ;;  %vm331_vm7 = vcmp.gt.f32.partialorder %v1143_v7, 0.0 }
   0x3   :  { %v26_v2 = vld [vmem:[%s2140_s0 + $0x40] sm:$0xff]  ;;  %988 = vmatpush.msra.mxu2 %v50_v0  ;;  %955 = vmatmul.msk.f32.vlgmr.msra.gmra.mxu0 %vm87_vm0, %v18_v1  ;;  %v1170_v12 = vld [vmem:[%s2143_s3 + $0x8] sm:$0xff]  ;;  %v1188_v16 = vld [vmem:[%s2143_s3 + $0x38] sm:$0xff]  ;;  %vm397_vm9 = vweird.f32 %v1161_v10 }
   0x4   :  { %v34_v3 = vld [vmem:[%s2140_s0 + $0x80] sm:$0xff]  ;;  %963 = vmatmul.msk.f32.vlgmr.msra.gmra.mxu1 %vm87_vm0, %v26_v2  ;;  %989 = vmatpush.msra.mxu3 %v50_v0  ;;  %v27_v13 = vld [vmem:[%s2140_s0 + $0x48] sm:$0xff]  ;;  %v1205_v19 = vld [vmem:[%s2143_s3 + $0x30] sm:$0xff] }
   0x5   :  { %v42_v4 = vld [vmem:[%s2140_s0 + $0xc0] sm:$0xff]  ;;  %971 = vmatmul.msk.f32.vlgmr.msra.gmra.mxu2 %vm87_vm0, %v34_v3  ;;  %994 = vset.pattern.permute.xlu0 %v1088_v5  ;;  %v35_v14 = vld [vmem:[%s2140_s0 + $0x88] sm:$0xff]  ;;  %v1218_v22 = vld [vmem:[%s2143_s3 + $0x58] sm:$0xff] }
   0x6   :  { %v1138_v6 = vld [vmem:[%s2143_s3 + $0x20] sm:$0xff]  ;;  %979 = vmatmul.msk.f32.vlgmr.msra.gmra.mxu3 %vm87_vm0, %v42_v4  ;;  %v43_v17 = vld [vmem:[%s2140_s0 + $0xc8] sm:$0xff]  ;;  %v1232_v25 = vld [vmem:[%s2143_s3 + $0x50] sm:$0xff] }
   0x7   :  { %v1148_v8 = vld [vmem:[%s2143_s3] sm:$0xff]  ;;  %998 = vrsqrt.f32 %v1138_v6  ;;  %vm407_vm1 = vweird.f32 %v1138_v6  ;;  %vm333_vm3 = vcmp.gt.f32.partialorder %v1138_v6, 0.0  ;;  %v20_v30 = vld [vmem:[%s2140_s0 + $0x10] sm:$0xff] }
   0x8   :  { %1000 = vrsqrt.f32 %v1143_v7  ;;  %v1182_v15 = vld [vmem:[%s2143_s3 + $0x40] sm:$0xff]  ;;  %vm367_vm4 = vweird.f32 %v1148_v8  ;;  %vm329_vm10 = vcmp.gt.f32.partialorder %v1148_v8, 0.0  ;;  %v28_v34 = vld [vmem:[%s2140_s0 + $0x50] sm:$0xff] }
   0x9   :  { %1002 = vrsqrt.f32 %v1148_v8  ;;  %v36_v35 = vld [vmem:[%s2140_s0 + $0x90] sm:$0xff] }
   0xa   :  { %1004 = vrsqrt.f32 %v1156_v9  ;;  %v44_v47 = vld [vmem:[%s2140_s0 + $0xd0] sm:$0xff] }
   0xb   :  { %1006 = vrsqrt.f32 %v1161_v10  ;;  %956 = vmatmul.msk.f32.gmra.mxu0 %vm87_vm0, %v19_v11 }
   0xc   :  { %1008 = vrsqrt.f32 %v1170_v12  ;;  %964 = vmatmul.msk.f32.gmra.mxu1 %vm87_vm0, %v27_v13 }
   0xd   :  { %v1195_v18 = vpop.eup %998  ;;  %972 = vmatmul.msk.f32.gmra.mxu2 %vm87_vm0, %v35_v14  ;;  %1010 = vrsqrt.f32 %v1182_v15 }
   0xe   :  { %v1207_v20 = vpop.eup %1000  ;;  %v402_v21 = vmul.f32 %v1195_v18, %v1138_v6  ;;  %1012 = vrsqrt.f32 %v1188_v16  ;;  %980 = vmatmul.msk.f32.gmra.mxu3 %vm87_vm0, %v43_v17  ;;  %vm408_vm6 = vweird.f32 %v1195_v18 }
   0xf   :  { %v1220_v23 = vpop.eup %1002  ;;  %v382_v24 = vmul.f32 %v1207_v20, %v1143_v7  ;;  %vm388_vm8 = vweird.f32 %v1207_v20  ;;  %1014 = vrsqrt.f32 %v1205_v19  ;;  %vm1278_vm15 = vmor %vm407_vm1, %vm408_vm6 }
  0x10   :  { %v1234_v26 = vpop.eup %1004  ;;  %v403_v27 = vmul.f32 %v1195_v18, %v402_v21  ;;  %v362_v28 = vmul.f32 %v1220_v23, %v1148_v8  ;;  %vm368_vm11 = vweird.f32 %v1220_v23  ;;  %1016 = vrsqrt.f32 %v1218_v22  ;;  %vm1295_vm1 = vmor %vm387_vm2, %vm388_vm8 }
  0x11   :  { %v1243_v29 = vpop.eup %1006  ;;  %v383_v31 = vmul.f32 %v1207_v20, %v382_v24  ;;  %v412_v32 = vmul.f32 %v1234_v26, %v1156_v9  ;;  %vm418_vm13 = vweird.f32 %v1234_v26  ;;  %1018 = vrsqrt.f32 %v1232_v25  ;;  %vm1308_vm12 = vmor %vm367_vm4, %vm368_vm11 }
  0x12   :  { %v1253_v33 = vpop.eup %1008  ;;  %v404_v36 = vmul.f32 0.5, %v403_v27  ;;  %v363_v37 = vmul.f32 %v1220_v23, %v362_v28  ;;  %v392_v38 = vmul.f32 %v1243_v29, %v1161_v10  ;;  %vm398_vm14 = vweird.f32 %v1243_v29 }
  0x13   :  { %v1265_v39 = vpop.eup %1010  ;;  %v384_v40 = vmul.f32 0.5, %v383_v31  ;;  %v413_v41 = vmul.f32 %v1234_v26, %v412_v32  ;;  %v372_v42 = vmul.f32 %v1253_v33, %v1170_v12  ;;  %957 = vmatmul.msk.f32.gmra.mxu0 %vm87_vm0, %v20_v30  ;;  %vm378_vm6 = vweird.f32 %v1253_v33 }
  0x14   :  { %v1271_v43 = vpop.eup %1012  ;;  %v405_v44 = vsub.f32 1.5, %v404_v36  ;;  %v364_v46 = vmul.f32 0.5, %v363_v37  ;;  %v393_v48 = vmul.f32 %v1243_v29, %v392_v38  ;;  %v442_v49 = vmul.f32 %v1265_v39, %v1182_v15  ;;  %965 = vmatmul.msk.f32.gmra.mxu1 %vm87_vm0, %v28_v34 }
  0x15   :  { %973 = vmatmul.msk.f32.gmra.mxu2 %vm87_vm0, %v36_v35  ;;  %v385_v50 = vsub.f32 1.5, %v384_v40  ;;  %v414_v52 = vmul.f32 0.5, %v413_v41  ;;  %v373_v53 = vmul.f32 %v1253_v33, %v372_v42  ;;  %v1301_v54 = vpop.eup %1014  ;;  %v432_v0 = vmul.f32 %v1271_v43, %v1188_v16 }
  0x16   :  { %v406_v55 = vmul.f32 %v1195_v18, %v405_v44  ;;  %v365_v56 = vsub.f32 1.5, %v364_v46  ;;  %v394_v58 = vmul.f32 0.5, %v393_v48  ;;  %v443_v59 = vmul.f32 %v1265_v39, %v442_v49  ;;  %v1313_v60 = vpop.eup %1016  ;;  %981 = vmatmul.msk.f32.gmra.mxu3 %vm87_vm0, %v44_v47 }
  0x17   :  { %v386_v61 = vmul.f32 %v1207_v20, %v385_v50  ;;  %v415_v62 = vsub.f32 1.5, %v414_v52  ;;  %v374_v63 = vmul.f32 0.5, %v373_v53 }
  0x18   :  { %9 = vsyncpa [#allocation3], 0  ;;  %v1319_v1 = vpop.eup %1018  ;;  %v410_v2 = vsel %vm1278_vm15, %v1195_v18, %v406_v55  ;;  %v366_v3 = vmul.f32 %v1220_v23, %v365_v56  ;;  %v395_v4 = vsub.f32 1.5, %v394_v58  ;;  %v444_v5 = vmul.f32 0.5, %v443_v59  ;;  %v21_v14 = vld [vmem:[%s2140_s0 + $0x18] sm:$0xff]  ;;  %v1419_v47 = vld [vmem:[%s2143_s3 + $0x70] sm:$0xff] }
  0x19   :  { %v685_v11 = vsel %vm333_vm3, %v410_v2, 0.0  ;;  %v390_v13 = vsel %vm1295_vm1, %v1207_v20, %v386_v61  ;;  %v416_v17 = vmul.f32 %v1234_v26, %v415_v62  ;;  %vm1338_vm2 = vmor %vm417_vm5, %vm418_vm13  ;;  %v375_v6 = vsub.f32 1.5, %v374_v63  ;;  %v29_v24 = vld [vmem:[%s2140_s0 + $0x58] sm:$0xff]  ;;  %v30_v49 = vld [vmem:[%s2140_s0 + $0x60] sm:$0xff]  ;;  %s943_s13 = sshll.u32 %s2144_s4, 4  ;;  %s1090_s14 = smov 128   ;;  %s944_s13 = int_to_ptr.hbm [resolvable:$true] %s943_s13 }
  0x1a   :  { %735 = vperm.xlu2 %996, %v685_v11   ;;  %v683_v21 = vsel %vm331_vm7, %v390_v13, 0.0  ;;  %v370_v20 = vsel %vm1308_vm12, %v1220_v23, %v366_v3  ;;  %v37_v27 = vld [vmem:[%s2140_s0 + $0x98] sm:$0xff]  ;;  %vm332_vm3 = vcmp.gt.f32.partialorder %v1161_v10, 0.0  ;;  %v396_v28 = vmul.f32 %v1243_v29, %v395_v4  ;;  %vm1359_vm4 = vmor %vm397_vm9, %vm398_vm14  ;;  %v22_v10 = vld [vmem:[%s2140_s0 + $0x20] sm:$0xff]  ;;  %s1091_s15 = smov 8  }
  0x1b   :  { %725 = vperm.xlu1 %995, %v683_v21   ;;  %v681_v23 = vsel %vm329_vm10, %v370_v20, 0.0  ;;  %vm330_vm5 = vcmp.gt.f32.partialorder %v1170_v12, 0.0  ;;  %v376_v30 = vmul.f32 %v1253_v33, %v375_v6  ;;  %vm2155_vm7 = vweird.f32 %v1170_v12  ;;  %958 = vmatmul.msk.f32.gmra.mxu0 %vm87_vm0, %v21_v14  ;;  %v45_v34 = vld [vmem:[%s2140_s0 + $0xd8] sm:$0xff]  ;;  %v38_v52 = vld [vmem:[%s2140_s0 + $0xa0] sm:$0xff]  ;;  %v1456_v57 = vld [vmem:[%s2143_s3 + $0x68] sm:$0xff] }
  0x1c   :  { %vm1371_vm8 = vmor %vm2155_vm7, %vm378_vm6  ;;  %v433_v32 = vmul.f32 %v1271_v43, %v432_v0  ;;  %715 = vperm.xlu0 %994, %v681_v23   ;;  %v420_v8 = vsel %vm1338_vm2, %v1234_v26, %v416_v17  ;;  %vm337_vm9 = vcmp.gt.f32.partialorder %v1182_v15, 0.0  ;;  %v445_v35 = vsub.f32 1.5, %v444_v5  ;;  %966 = vmatmul.msk.f32.gmra.mxu1 %vm87_vm0, %v29_v24  ;;  %v1464_v59 = vld [vmem:[%s2143_s3 + $0x60] sm:$0xff]  ;;  %v23_v20 = vld [vmem:[%s2140_s0 + $0x28] sm:$0xff] }
  0x1d   :  { %vm447_vm10 = vweird.f32 %v1182_v15  ;;  %974 = vmatmul.msk.f32.gmra.mxu2 %vm87_vm0, %v37_v27  ;;  %v400_v36 = vsel %vm1359_vm4, %v1243_v29, %v396_v28  ;;  %vm437_vm11 = vweird.f32 %v1188_v16  ;;  %v422_v26 = vmul.f32 %v1301_v54, %v1205_v19  ;;  %v46_v63 = vld [vmem:[%s2140_s0 + $0xe0] sm:$0xff]  ;;  %v1546_v24 = vld [vmem:[%s2143_s3 + $0x78] sm:$0xff]  ;;  %v31_v27 = vld [vmem:[%s2140_s0 + $0x68] sm:$0xff] }
  0x1e   :  { %v434_v37 = vmul.f32 0.5, %v433_v32  ;;  %v380_v38 = vsel %vm1371_vm8, %v1253_v33, %v376_v30  ;;  %vm448_vm12 = vweird.f32 %v1265_v39  ;;  %vm427_vm13 = vweird.f32 %v1205_v19  ;;  %982 = vmatmul.msk.f32.gmra.mxu3 %vm87_vm0, %v45_v34  ;;  %v1408_v33 = vld [vmem:[%s2143_s3 + $0x48] sm:$0xff]  ;;  %v1516_v15 = vld [vmem:[%s2143_s3 + $0x80] sm:$0xff]  ;;  %v32_v53 = vld [vmem:[%s2140_s0 + $0x70] sm:$0xff] }
  0x1f   :  { %v472_v40 = vmul.f32 %v1313_v60, %v1218_v22  ;;  %vm2158_vm14 = vcmp.gt.f32.partialorder %v1156_v9, 0.0  ;;  %vm438_vm15 = vweird.f32 %v1271_v43  ;;  %v423_v42 = vmul.f32 %v1301_v54, %v422_v26  ;;  %vm1433_vm1 = vmor %vm447_vm10, %vm448_vm12  ;;  %v39_v28 = vld [vmem:[%s2140_s0 + $0xa8] sm:$0xff]  ;;  %v40_v62 = vld [vmem:[%s2140_s0 + $0xb0] sm:$0xff] }
  0x20   :  { %v686_v29 = vsel %vm2158_vm14, %v420_v8, 0.0  ;;  %v435_v41 = vsub.f32 1.5, %v434_v37  ;;  %v684_v44 = vsel %vm332_vm3, %v400_v36, 0.0  ;;  %v446_v45 = vmul.f32 %v1265_v39, %v445_v35  ;;  %vm1447_vm3 = vmor %vm437_vm11, %vm438_vm15  ;;  %v47_v8 = vld [vmem:[%s2140_s0 + $0xe8] sm:$0xff]  ;;  %v1584_v36 = vld [vmem:[%s2143_s3 + $0xa0] sm:$0xff] }
  0x21   :  { %v473_v9 = vmul.f32 %v1313_v60, %v472_v40  ;;  %v462_v46 = vmul.f32 %v1319_v1, %v1232_v25  ;;  %v682_v48 = vsel %vm330_vm5, %v380_v38, 0.0  ;;  %v424_v12 = vmul.f32 0.5, %v423_v42 }
  0x22   :  { %v436_v51 = vmul.f32 %v1271_v43, %v435_v41  ;;  %vm428_vm6 = vweird.f32 %v1301_v54  ;;  %740 = vperm.xlu2 %996, %v686_v29   ;;  %vm336_vm2 = vcmp.gt.f32.partialorder %v1188_v16, 0.0  ;;  %1020 = vrsqrt.f32 %v1408_v33 }
  0x23   :  { %v474_v55 = vmul.f32 0.5, %v473_v9  ;;  %v463_v56 = vmul.f32 %v1319_v1, %v462_v46  ;;  %730 = vperm.xlu1 %995, %v684_v44   ;;  %vm335_vm4 = vcmp.gt.f32.partialorder %v1205_v19, 0.0  ;;  %v425_v58 = vsub.f32 1.5, %v424_v12  ;;  %959 = vmatmul.msk.f32.gmra.mxu0 %vm87_vm0, %v22_v10  ;;  %vm1474_vm7 = vmor %vm427_vm13, %vm428_vm6  ;;  %v1779_v9 = vld [vmem:[%s2143_s3 + $0xd0] sm:$0xff] }
  0x24   :  { %vm477_vm5 = vweird.f32 %v1218_v22  ;;  %1022 = vrsqrt.f32 %v1419_v47  ;;  %720 = vperm.xlu0 %994, %v682_v48   ;;  %v450_v61 = vsel %vm1433_vm1, %v1265_v39, %v446_v45  ;;  %vm478_vm8 = vweird.f32 %v1313_v60  ;;  %v1485_v39 = vld [vmem:[%s2143_s3 + $0x88] sm:$0xff]  ;;  %967 = vmatmul.msk.f32.gmra.mxu1 %vm87_vm0, %v30_v49  ;;  %v24_v49 = vld [vmem:[%s2140_s0 + $0x30] sm:$0xff] }
  0x25   :  { %v475_v0 = vsub.f32 1.5, %v474_v55  ;;  %v464_v2 = vmul.f32 0.5, %v463_v56  ;;  %975 = vmatmul.msk.f32.gmra.mxu2 %vm87_vm0, %v38_v52  ;;  %v440_v3 = vsel %vm1447_vm3, %v1271_v43, %v436_v51  ;;  %v426_v4 = vmul.f32 %v1301_v54, %v425_v58  ;;  %vm1508_vm12 = vmor %vm477_vm5, %vm478_vm8 }
  0x26   :  { %vm467_vm10 = vweird.f32 %v1232_v25  ;;  %1024 = vrsqrt.f32 %v1456_v57  ;;  %vm468_vm11 = vweird.f32 %v1319_v1  ;;  %v689_v13 = vsel %vm337_vm9, %v450_v61, 0.0  ;;  %983 = vmatmul.msk.f32.gmra.mxu3 %vm87_vm0, %v46_v63 }
  0x27   :  { %v476_v5 = vmul.f32 %v1313_v60, %v475_v0  ;;  %v465_v11 = vsub.f32 1.5, %v464_v2  ;;  %1026 = vrsqrt.f32 %v1464_v59  ;;  %v430_v43 = vsel %vm1474_vm7, %v1301_v54, %v426_v4  ;;  %vm1536_vm14 = vmor %vm467_vm10, %vm468_vm11 }
  0x28   :  { %1028 = vrsqrt.f32 %v1485_v39  ;;  %v1518_v17 = vpop.eup %1020  ;;  %v688_v54 = vsel %vm336_vm2, %v440_v3, 0.0  ;;  %vm340_vm9 = vcmp.gt.f32.partialorder %v1218_v22, 0.0  ;;  %v687_v21 = vsel %vm335_vm4, %v430_v43, 0.0 }
  0x29   :  { %v466_v18 = vmul.f32 %v1319_v1, %v465_v11  ;;  %vm339_vm13 = vcmp.gt.f32.partialorder %v1232_v25, 0.0  ;;  %vm338_vm15 = vcmp.gt.f32.partialorder %v1408_v33, 0.0  ;;  %v452_v19 = vmul.f32 %v1518_v17, %v1408_v33 }
  0x2a   :  { %v1524_v6 = vpop.eup %1022  ;;  %755 = vperm.xlu2 %996, %v689_v13   ;;  %v480_v7 = vsel %vm1508_vm12, %v1313_v60, %v476_v5  ;;  %vm457_vm1 = vweird.f32 %v1408_v33  ;;  %1030 = vrsqrt.f32 %v1516_v15  ;;  %vm507_vm6 = vweird.f32 %v1419_v47  ;;  %v48_v33 = vld [vmem:[%s2140_s0 + $0xf0] sm:$0xff] }
  0x2b   :  { %v502_v23 = vmul.f32 %v1524_v6, %v1419_v47  ;;  %750 = vperm.xlu1 %995, %v688_v54   ;;  %v453_v31 = vmul.f32 %v1518_v17, %v452_v19  ;;  %vm497_vm2 = vweird.f32 %v1456_v57  ;;  %vm487_vm3 = vweird.f32 %v1464_v59  ;;  %960 = vmatmul.msk.f32.gmra.mxu0 %vm87_vm0, %v23_v20  ;;  %v1693_v20 = vld [vmem:[%s2143_s3 + $0x98] sm:$0xff] }
  0x2c   :  { %v1561_v30 = vpop.eup %1024  ;;  %745 = vperm.xlu0 %994, %v687_v21   ;;  %v470_v60 = vsel %vm1536_vm14, %v1319_v1, %v466_v18  ;;  %vm343_vm4 = vcmp.gt.f32.partialorder %v1419_v47, 0.0  ;;  %1032 = vrsqrt.f32 %v1546_v24  ;;  %968 = vmatmul.msk.f32.gmra.mxu1 %vm87_vm0, %v31_v27  ;;  %v692_v1 = vsel %vm340_vm9, %v480_v7, 0.0  ;;  %v1703_v7 = vld [vmem:[%s2143_s3 + $0x90] sm:$0xff] }
  0x2d   :  { %v1567_v32 = vpop.eup %1026  ;;  %v503_v34 = vmul.f32 %v1524_v6, %v502_v23  ;;  %v492_v35 = vmul.f32 %v1561_v30, %v1456_v57  ;;  %976 = vmatmul.msk.f32.gmra.mxu2 %vm87_vm0, %v39_v28  ;;  %v454_v26 = vmul.f32 0.5, %v453_v31  ;;  %vm458_vm5 = vweird.f32 %v1518_v17  ;;  %v25_v31 = vld [vmem:[%s2140_s0 + $0x38] sm:$0xff] }
  0x2e   :  { %v1586_v37 = vpop.eup %1028  ;;  %vm342_vm7 = vcmp.gt.f32.partialorder %v1456_v57, 0.0  ;;  %v482_v38 = vmul.f32 %v1567_v32, %v1464_v59  ;;  %vm508_vm8 = vweird.f32 %v1524_v6  ;;  %vm537_vm10 = vweird.f32 %v1485_v39  ;;  %984 = vmatmul.msk.f32.gmra.mxu3 %vm87_vm0, %v47_v8  ;;  %vm1613_vm12 = vmor %vm457_vm1, %vm458_vm5  ;;  %v1728_v8 = vld [vmem:[%s2143_s3 + $0xb8] sm:$0xff] }
  0x2f   :  { %v504_v40 = vmul.f32 0.5, %v503_v34  ;;  %v493_v29 = vmul.f32 %v1561_v30, %v492_v35  ;;  %v532_v41 = vmul.f32 %v1586_v37, %v1485_v39  ;;  %v691_v22 = vsel %vm339_vm13, %v470_v60, 0.0  ;;  %vm1627_vm13 = vmor %vm507_vm6, %vm508_vm8  ;;  %v33_v35 = vld [vmem:[%s2140_s0 + $0x78] sm:$0xff] }
  0x30   :  { %v455_v42 = vsub.f32 1.5, %v454_v26  ;;  %vm341_vm11 = vcmp.gt.f32.partialorder %v1464_v59, 0.0  ;;  %v483_v44 = vmul.f32 %v1567_v32, %v482_v38  ;;  %1034 = vrsqrt.f32 %v1584_v36  ;;  %v1607_v45 = vpop.eup %1030  ;;  %v1748_v59 = vld [vmem:[%s2143_s3 + $0xb0] sm:$0xff]  ;;  %v41_v38 = vld [vmem:[%s2140_s0 + $0xb8] sm:$0xff] }
  0x31   :  { %v505_v25 = vsub.f32 1.5, %v504_v40  ;;  %v494_v46 = vmul.f32 0.5, %v493_v29  ;;  %vm498_vm9 = vweird.f32 %v1561_v30  ;;  %v533_v48 = vmul.f32 %v1586_v37, %v532_v41  ;;  %v1757_v29 = vld [vmem:[%s2143_s3 + $0xa8] sm:$0xff] }
  0x32   :  { %v456_v10 = vmul.f32 %v1518_v17, %v455_v42  ;;  %v484_v51 = vmul.f32 0.5, %v483_v44  ;;  %vm488_vm14 = vweird.f32 %v1567_v32  ;;  %v522_v12 = vmul.f32 %v1607_v45, %v1516_v15  ;;  %v1634_v52 = vpop.eup %1032  ;;  %770 = vperm.xlu2 %996, %v692_v1   ;;  %vm1651_vm6 = vmor %vm497_vm2, %vm498_vm9  ;;  %v49_v44 = vld [vmem:[%s2140_s0 + $0xf8] sm:$0xff] }
  0x33   :  { %v506_v55 = vmul.f32 %v1524_v6, %v505_v25  ;;  %v495_v56 = vsub.f32 1.5, %v494_v46  ;;  %v534_v58 = vmul.f32 0.5, %v533_v48  ;;  %vm527_vm1 = vweird.f32 %v1516_v15  ;;  %765 = vperm.xlu1 %995, %v691_v22   ;;  %961 = vmatmul.msk.f32.gmra.mxu0 %vm87_vm0, %v24_v49  ;;  %vm1669_vm2 = vmor %vm487_vm3, %vm488_vm14 }
  0x34   :  { %v460_v61 = vsel %vm1613_vm12, %v1518_v17, %v456_v10  ;;  %v485_v0 = vsub.f32 1.5, %v484_v51  ;;  %v523_v2 = vmul.f32 %v1607_v45, %v522_v12  ;;  %v512_v3 = vmul.f32 %v1634_v52, %v1546_v24  ;;  %969 = vmatmul.msk.f32.gmra.mxu1 %vm87_vm0, %v32_v53 }
  0x35   :  { %v690_v4 = vsel %vm338_vm15, %v460_v61, 0.0  ;;  %v510_v5 = vsel %vm1627_vm13, %v1524_v6, %v506_v55  ;;  %v496_v11 = vmul.f32 %v1561_v30, %v495_v56  ;;  %v535_v43 = vsub.f32 1.5, %v534_v58  ;;  %977 = vmatmul.msk.f32.gmra.mxu2 %vm87_vm0, %v40_v62 }
  0x36   :  { %v1676_v14 = vpop.eup %1034  ;;  %760 = vperm.xlu0 %994, %v690_v4   ;;  %v486_v17 = vmul.f32 %v1567_v32, %v485_v0  ;;  %v524_v54 = vmul.f32 0.5, %v523_v2  ;;  %v513_v18 = vmul.f32 %v1634_v52, %v512_v3  ;;  %vm517_vm15 = vweird.f32 %v1546_v24  ;;  %985 = vmatmul.msk.f32.gmra.mxu3 %vm87_vm0, %v48_v33 }
  0x37   :  { %v500_v6 = vsel %vm1651_vm6, %v1561_v30, %v496_v11  ;;  %vm538_vm3 = vweird.f32 %v1586_v37  ;;  %vm528_vm5 = vweird.f32 %v1607_v45  ;;  %v562_v21 = vmul.f32 %v1676_v14, %v1584_v36 }
  0x38   :  { %v695_v16 = vsel %vm343_vm4, %v510_v5, 0.0  ;;  %v490_v19 = vsel %vm1669_vm2, %v1567_v32, %v486_v17  ;;  %v525_v27 = vsub.f32 1.5, %v524_v54  ;;  %v514_v28 = vmul.f32 0.5, %v513_v18  ;;  %vm1718_vm8 = vmor %vm537_vm10, %vm538_vm3 }
  0x39   :  { %v694_v23 = vsel %vm342_vm7, %v500_v6, 0.0  ;;  %v536_v30 = vmul.f32 %v1586_v37, %v535_v43  ;;  %v563_v47 = vmul.f32 %v1676_v14, %v562_v21  ;;  %vm567_vm4 = vweird.f32 %v1584_v36  ;;  %vm1739_vm10 = vmor %vm527_vm1, %vm528_vm5 }
  0x3a   :  { %v526_v57 = vmul.f32 %v1607_v45, %v525_v27  ;;  %v515_v60 = vsub.f32 1.5, %v514_v28  ;;  %vm518_vm7 = vweird.f32 %v1634_v52  ;;  %1036 = vrsqrt.f32 %v1693_v20  ;;  %785 = vperm.xlu2 %996, %v695_v16  }
  0x3b   :  { %v693_v34 = vsel %vm341_vm11, %v490_v19, 0.0  ;;  %v564_v26 = vmul.f32 0.5, %v563_v47  ;;  %vm568_vm12 = vweird.f32 %v1676_v14  ;;  %1038 = vrsqrt.f32 %v1703_v7  ;;  %780 = vperm.xlu1 %995, %v694_v23   ;;  %962 = vmatmul.msk.f32.gmra.mxu0 %vm87_vm0, %v25_v31  ;;  %vm1768_vm9 = vmor %vm517_vm15, %vm518_vm7 }
  0x3c   :  { %v516_v40 = vmul.f32 %v1634_v52, %v515_v60  ;;  %vm346_vm11 = vcmp.gt.f32.partialorder %v1485_v39, 0.0  ;;  %v540_v41 = vsel %vm1718_vm8, %v1586_v37, %v536_v30  ;;  %1040 = vrsqrt.f32 %v1728_v8  ;;  %970 = vmatmul.msk.f32.gmra.mxu1 %vm87_vm0, %v33_v35  ;;  %vm1790_vm14 = vmor %vm567_vm4, %vm568_vm12 }
  0x3d   :  { %v565_v42 = vsub.f32 1.5, %v564_v26  ;;  %vm345_vm13 = vcmp.gt.f32.partialorder %v1516_v15, 0.0  ;;  %v530_v37 = vsel %vm1739_vm10, %v1607_v45, %v526_v57  ;;  %1042 = vrsqrt.f32 %v1748_v59  ;;  %978 = vmatmul.msk.f32.gmra.mxu2 %vm87_vm0, %v41_v38  ;;  %v1802_v45 = vld [vmem:[%s2143_s3 + $0xc8] sm:$0xff]  ;;  %v1834_v15 = vld [vmem:[%s2143_s3 + $0xc0] sm:$0xff] }
  0x3e   :  { %775 = vperm.xlu0 %994, %v693_v34   ;;  %vm344_vm1 = vcmp.gt.f32.partialorder %v1546_v24, 0.0  ;;  %1044 = vrsqrt.f32 %v1757_v29  ;;  %v698_v10 = vsel %vm346_vm11, %v540_v41, 0.0  ;;  %v520_v49 = vsel %vm1768_vm9, %v1634_v52, %v516_v40  ;;  %986 = vmatmul.msk.f32.gmra.mxu3 %vm87_vm0, %v49_v44 }
  0x3f   :  { %v566_v46 = vmul.f32 %v1676_v14, %v565_v42  ;;  %vm349_vm6 = vcmp.gt.f32.partialorder %v1584_v36, 0.0  ;;  %1046 = vrsqrt.f32 %v1779_v9  ;;  %v697_v51 = vsel %vm345_vm13, %v530_v37, 0.0  ;;  %v1861_v36 = vld [vmem:[%s2143_s3 + $0xe8] sm:$0xff] }
  0x40   :  { %v1804_v48 = vpop.eup %1036  ;;  %vm348_vm2 = vcmp.gt.f32.partialorder %v1693_v20, 0.0  ;;  %vm557_vm15 = vweird.f32 %v1693_v20  ;;  %vm347_vm0 = vcmp.gt.f32.partialorder %v1703_v7, 0.0  ;;  %vm547_vm3 = vweird.f32 %v1703_v7 }
  0x41   :  { %v1814_v50 = vpop.eup %1038  ;;  %v570_v39 = vsel %vm1790_vm14, %v1676_v14, %v566_v46  ;;  %v552_v12 = vmul.f32 %v1804_v48, %v1693_v20  ;;  %vm597_vm5 = vweird.f32 %v1728_v8  ;;  %1048 = vrsqrt.f32 %v1802_v45 }
  0x42   :  { %v542_v52 = vmul.f32 %v1814_v50, %v1703_v7  ;;  %v1836_v53 = vpop.eup %1040  ;;  %800 = vperm.xlu2 %996, %v698_v10   ;;  %v696_v55 = vsel %vm344_vm1, %v520_v49, 0.0  ;;  %vm587_vm4 = vweird.f32 %v1748_v59  ;;  %vm577_vm8 = vweird.f32 %v1757_v29 }
  0x43   :  { %v553_v56 = vmul.f32 %v1804_v48, %v552_v12  ;;  %v1843_v58 = vpop.eup %1042  ;;  %795 = vperm.xlu1 %995, %v697_v51   ;;  %v701_v61 = vsel %vm349_vm6, %v570_v39, 0.0  ;;  %vm558_vm7 = vweird.f32 %v1804_v48  ;;  %v592_v24 = vmul.f32 %v1836_v53, %v1728_v8 }
  0x44   :  { %v543_v62 = vmul.f32 %v1814_v50, %v542_v52  ;;  %v1851_v63 = vpop.eup %1044  ;;  %vm548_vm10 = vweird.f32 %v1814_v50  ;;  %vm352_vm12 = vcmp.gt.f32.partialorder %v1728_v8, 0.0  ;;  %v582_v2 = vmul.f32 %v1843_v58, %v1748_v59  ;;  %vm1880_vm14 = vmor %vm557_vm15, %vm558_vm7  ;;  %v1964_v52 = vld [vmem:[%s2143_s3 + $0xe0] sm:$0xff] }
  0x45   :  { %v554_v0 = vmul.f32 0.5, %v553_v56  ;;  %1050 = vrsqrt.f32 %v1834_v15  ;;  %v1863_v3 = vpop.eup %1046  ;;  %v593_v5 = vmul.f32 %v1836_v53, %v592_v24  ;;  %vm598_vm11 = vweird.f32 %v1836_v53  ;;  %vm1891_vm1 = vmor %vm547_vm3, %vm548_vm10  ;;  %v1990_v24 = vld [vmem:[%s2143_s3 + $0xf8] sm:$0xff] }
  0x46   :  { %790 = vperm.xlu0 %994, %v696_v55   ;;  %v544_v4 = vmul.f32 0.5, %v543_v62  ;;  %v572_v11 = vmul.f32 %v1851_v63, %v1757_v29  ;;  %vm351_vm9 = vcmp.gt.f32.partialorder %v1748_v59, 0.0  ;;  %v583_v43 = vmul.f32 %v1843_v58, %v582_v2  ;;  %vm1909_vm15 = vmor %vm597_vm5, %vm598_vm11 }
  0x47   :  { %v555_v13 = vsub.f32 1.5, %v554_v0  ;;  %vm588_vm13 = vweird.f32 %v1843_v58  ;;  %v622_v33 = vmul.f32 %v1863_v3, %v1779_v9  ;;  %v1874_v14 = vpop.eup %1048  ;;  %v594_v18 = vmul.f32 0.5, %v593_v5 }
  0x48   :  { %v545_v54 = vsub.f32 1.5, %v544_v4  ;;  %v573_v6 = vmul.f32 %v1851_v63, %v572_v11  ;;  %1052 = vrsqrt.f32 %v1861_v36  ;;  %v584_v19 = vmul.f32 0.5, %v583_v43  ;;  %vm1924_vm3 = vmor %vm587_vm4, %vm588_vm13 }
  0x49   :  { %v556_v21 = vmul.f32 %v1804_v48, %v555_v13  ;;  %v623_v27 = vmul.f32 %v1863_v3, %v622_v33  ;;  %v612_v28 = vmul.f32 %v1874_v14, %v1802_v45  ;;  %v595_v30 = vsub.f32 1.5, %v594_v18 }
  0x4a   :  { %v546_v23 = vmul.f32 %v1814_v50, %v545_v54  ;;  %v574_v47 = vmul.f32 0.5, %v573_v6  ;;  %vm578_vm6 = vweird.f32 %v1851_v63  ;;  %815 = vperm.xlu2 %996, %v701_v61   ;;  %v585_v60 = vsub.f32 1.5, %v584_v19  ;;  %v1981_v61 = vld [vmem:[%s2143_s3 + $0xd8] sm:$0xff] }
  0x4b   :  { %v1900_v31 = vpop.eup %1050  ;;  %v560_v32 = vsel %vm1880_vm14, %v1804_v48, %v556_v21  ;;  %v624_v34 = vmul.f32 0.5, %v623_v27  ;;  %v613_v35 = vmul.f32 %v1874_v14, %v612_v28  ;;  %v596_v38 = vmul.f32 %v1836_v53, %v595_v30 }
  0x4c   :  { %v700_v1 = vsel %vm348_vm2, %v560_v32, 0.0  ;;  %v550_v26 = vsel %vm1891_vm1, %v1814_v50, %v546_v23  ;;  %v575_v41 = vsub.f32 1.5, %v574_v47  ;;  %v586_v22 = vmul.f32 %v1843_v58, %v585_v60  ;;  %vm1935_vm2 = vmor %vm577_vm8, %vm578_vm6 }
  0x4d   :  { %810 = vperm.xlu1 %995, %v700_v1   ;;  %v699_v20 = vsel %vm347_vm0, %v550_v26, 0.0  ;;  %v625_v44 = vsub.f32 1.5, %v624_v34  ;;  %v614_v37 = vmul.f32 0.5, %v613_v35  ;;  %v600_v7 = vsel %vm1909_vm15, %v1836_v53, %v596_v38 }
  0x4e   :  { %v1939_v25 = vpop.eup %1052  ;;  %805 = vperm.xlu0 %994, %v699_v20   ;;  %vm350_vm0 = vcmp.gt.f32.partialorder %v1757_v29, 0.0  ;;  %v576_v46 = vmul.f32 %v1851_v63, %v575_v41  ;;  %v602_v48 = vmul.f32 %v1900_v31, %v1834_v15  ;;  %v590_v10 = vsel %vm1924_vm3, %v1843_v58, %v586_v22  ;;  %v1999_v29 = vld [vmem:[%s2143_s3 + $0xf0] sm:$0xff] }
  0x4f   :  { %vm627_vm5 = vweird.f32 %v1779_v9  ;;  %vm628_vm4 = vweird.f32 %v1863_v3  ;;  %v615_v49 = vsub.f32 1.5, %v614_v37  ;;  %v704_v50 = vsel %vm352_vm12, %v600_v7, 0.0 }
  0x50   :  { %v580_v51 = vsel %vm1935_vm2, %v1851_v63, %v576_v46  ;;  %v603_v39 = vmul.f32 %v1900_v31, %v602_v48  ;;  %v652_v12 = vmul.f32 %v1939_v25, %v1861_v36  ;;  %v626_v53 = vmul.f32 %v1863_v3, %v625_v44  ;;  %vm1972_vm12 = vmor %vm627_vm5, %vm628_vm4 }
  0x51   :  { %vm617_vm8 = vweird.f32 %v1802_v45  ;;  %vm618_vm7 = vweird.f32 %v1874_v14  ;;  %vm607_vm10 = vweird.f32 %v1834_v15  ;;  %v703_v8 = vsel %vm351_vm9, %v590_v10, 0.0 }
  0x52   :  { %v604_v56 = vmul.f32 0.5, %v603_v39  ;;  %vm608_vm11 = vweird.f32 %v1900_v31  ;;  %v653_v58 = vmul.f32 %v1939_v25, %v652_v12  ;;  %830 = vperm.xlu2 %996, %v704_v50   ;;  %v702_v62 = vsel %vm350_vm0, %v580_v51, 0.0  ;;  %vm1992_vm9 = vmor %vm617_vm8, %vm618_vm7  ;;  %v2071_v39 = vld [vmem:[%s2142_s2] ss:$0 sm:$0xff]  ;;  %s1089_s2 = smov [#allocation2]  }
  0x53   :  { %v616_v59 = vmul.f32 %v1874_v14, %v615_v49  ;;  %1054 = vrsqrt.f32 %v1964_v52  ;;  %vm355_vm13 = vcmp.gt.f32.partialorder %v1779_v9, 0.0  ;;  %v630_v4 = vsel %vm1972_vm12, %v1863_v3, %v626_v53  ;;  %vm2009_vm14 = vmor %vm607_vm10, %vm608_vm11  ;;  %s941_s10 = sshll.u32 %s1089_s2, 4  ;;  %s942_s10 = int_to_ptr.vmem [resolvable:$true] %s941_s10 }
  0x54   :  { %v605_v0 = vsub.f32 1.5, %v604_v56  ;;  %v654_v2 = vmul.f32 0.5, %v653_v58  ;;  %vm657_vm1 = vweird.f32 %v1861_v36  ;;  %1056 = vrsqrt.f32 %v1981_v61 }
  0x55   :  { %825 = vperm.xlu1 %995, %v703_v8   ;;  %vm658_vm6 = vweird.f32 %v1939_v25  ;;  %1058 = vrsqrt.f32 %v1990_v24  ;;  %vm354_vm15 = vcmp.gt.f32.partialorder %v1802_v45, 0.0  ;;  %v620_v3 = vsel %vm1992_vm9, %v1874_v14, %v616_v59 }
  0x56   :  { %820 = vperm.xlu0 %994, %v702_v62   ;;  %v606_v11 = vmul.f32 %v1900_v31, %v605_v0  ;;  %v655_v9 = vsub.f32 1.5, %v654_v2  ;;  %1060 = vrsqrt.f32 %v1999_v29  ;;  %v707_v13 = vsel %vm355_vm13, %v630_v4, 0.0  ;;  %vm2030_vm2 = vmor %vm657_vm1, %vm658_vm6 }
  0x57   :  { %vm353_vm3 = vcmp.gt.f32.partialorder %v1834_v15, 0.0  ;;  %v706_v54 = vsel %vm354_vm15, %v620_v3, 0.0  ;;  %vm358_vm0 = vcmp.gt.f32.partialorder %v1861_v36, 0.0  ;;  %vm647_vm5 = vweird.f32 %v1964_v52 }
  0x58   :  { %v610_v43 = vsel %vm2009_vm14, %v1900_v31, %v606_v11  ;;  %v656_v33 = vmul.f32 %v1939_v25, %v655_v9  ;;  %vm637_vm8 = vweird.f32 %v1981_v61  ;;  %vm357_vm10 = vcmp.gt.f32.partialorder %v1964_v52, 0.0 }
  0x59   :  { %v1055_v17 = vpop.eup %1054  ;;  %v705_v6 = vsel %vm353_vm3, %v610_v43, 0.0  ;;  %vm677_vm11 = vweird.f32 %v1990_v24  ;;  %vm356_vm13 = vcmp.gt.f32.partialorder %v1981_v61, 0.0  ;;  %vm667_vm1 = vweird.f32 %v1999_v29 }
  0x5a   :  { %v642_v14 = vmul.f32 %v1055_v17, %v1964_v52  ;;  %v1057_v18 = vpop.eup %1056  ;;  %845 = vperm.xlu2 %996, %v707_v13   ;;  %v660_v21 = vsel %vm2030_vm2, %v1939_v25, %v656_v33  ;;  %vm648_vm4 = vweird.f32 %v1055_v17  ;;  %vm360_vm2 = vcmp.gt.f32.partialorder %v1990_v24, 0.0 }
  0x5b   :  { %v1059_v15 = vpop.eup %1058  ;;  %v632_v19 = vmul.f32 %v1057_v18, %v1981_v61  ;;  %v710_v36 = vsel %vm358_vm0, %v660_v21, 0.0  ;;  %vm638_vm7 = vweird.f32 %v1057_v18  ;;  %vm2047_vm12 = vmor %vm647_vm5, %vm648_vm4  ;;  %vm359_vm0 = vcmp.gt.f32.partialorder %v1999_v29, 0.0 }
  0x5c   :  { %v643_v16 = vmul.f32 %v1055_v17, %v642_v14  ;;  %v1061_v27 = vpop.eup %1060  ;;  %v672_v28 = vmul.f32 %v1059_v15, %v1990_v24  ;;  %vm678_vm9 = vweird.f32 %v1059_v15  ;;  %vm639_vm14 = vmor %vm637_vm8, %vm638_vm7 }
  0x5d   :  { %840 = vperm.xlu1 %995, %v706_v54   ;;  %v633_v30 = vmul.f32 %v1057_v18, %v632_v19  ;;  %v662_v47 = vmul.f32 %v1061_v27, %v1999_v29  ;;  %vm668_vm6 = vweird.f32 %v1061_v27  ;;  %vm679_vm15 = vmor %vm677_vm11, %vm678_vm9 }
  0x5e   :  { %835 = vperm.xlu0 %994, %v705_v6   ;;  %v644_v23 = vmul.f32 0.5, %v643_v16  ;;  %v673_v31 = vmul.f32 %v1059_v15, %v672_v28  ;;  %vm669_vm3 = vmor %vm667_vm1, %vm668_vm6 }
  0x5f   :  { %v634_v57 = vmul.f32 0.5, %v633_v30  ;;  %v663_v60 = vmul.f32 %v1061_v27, %v662_v47 }
  0x60   :  { %v645_v32 = vsub.f32 1.5, %v644_v23  ;;  %v674_v35 = vmul.f32 0.5, %v673_v31 }
  0x61   :  { %v635_v26 = vsub.f32 1.5, %v634_v57  ;;  %v664_v38 = vmul.f32 0.5, %v663_v60 }
  0x62   :  { %v646_v1 = vmul.f32 %v1055_v17, %v645_v32  ;;  %860 = vperm.xlu2 %996, %v710_v36   ;;  %v675_v40 = vsub.f32 1.5, %v674_v35 }
  0x63   :  { %v636_v20 = vmul.f32 %v1057_v18, %v635_v26  ;;  %v665_v22 = vsub.f32 1.5, %v664_v38 }
  0x64   :  { %v650_v41 = vsel %vm2047_vm12, %v1055_v17, %v646_v1  ;;  %v676_v44 = vmul.f32 %v1059_v15, %v675_v40 }
  0x65   :  { %v709_v42 = vsel %vm357_vm10, %v650_v41, 0.0  ;;  %v640_v37 = vsel %vm639_vm14, %v1057_v18, %v636_v20  ;;  %v666_v25 = vmul.f32 %v1061_v27, %v665_v22 }
  0x66   :  { %855 = vperm.xlu1 %995, %v709_v42   ;;  %v708_v7 = vsel %vm356_vm13, %v640_v37, 0.0  ;;  %v680_v46 = vsel %vm679_vm15, %v1059_v15, %v676_v44 }
  0x67   :  { %850 = vperm.xlu0 %994, %v708_v7   ;;  %v670_v48 = vsel %vm669_vm3, %v1061_v27, %v666_v25  ;;  %v712_v10 = vsel %vm360_vm2, %v680_v46, 0.0 }
  0x68   :  { %v711_v49 = vsel %vm359_vm0, %v670_v48, 0.0 }
  0x6e   :  { %870 = vperm.xlu1 %995, %v712_v10  }
  0x6f   :  { %865 = vperm.xlu0 %994, %v711_v49  }
  0x74   :  { %v2064_v50 = vpop.permute.xlu2 %735 }
  0x7c   :  { %v2066_v51 = vpop.permute.xlu2 %740 }
  0x80   :  { %v201_v12 = vpop.f32.mrf.mxu0 }
  0x81   :  { %v225_v52 = vpop.f32.mrf.mxu1  ;;  %v202_v56 = vadd.f32 %v2071_v39, %v201_v12 }
  0x82   :  { %v226_v53 = vadd.f32 %v2071_v39, %v225_v52 }
  0x83   :  { %v297_v63 = vmax.f32 %v202_v56, 0.0 }
  0x84   :  { %v756_v8 = vpop.permute.xlu2 %755  ;;  %v305_v55 = vmax.f32 %v226_v53, 0.0 }
  0x86   :  { %v881_v58 = vmul.f32 %v756_v8, %v305_v55 }
  0x88   :  { %v2075_v61 = vpop.f32.mrf.mxu2  ;;  %913 = vst [vmem:[#allocation2 + $0x40] sm:$0xff] %v881_v58  ;;  %v204_v62 = vpop.f32.mrf.mxu0 }
  0x89   :  { %v228_v59 = vpop.f32.mrf.mxu1  ;;  %v2077_v24 = vpop.f32.mrf.mxu3  ;;  %v205_v5 = vadd.f32 %v2071_v39, %v204_v62 }
  0x8a   :  { %v229_v26 = vadd.f32 %v2071_v39, %v228_v59 }
  0x8b   :  { %v298_v33 = vmax.f32 %v205_v5, 0.0 }
  0x8c   :  { %v771_v0 = vpop.permute.xlu2 %770  ;;  %v306_v44 = vmax.f32 %v229_v26, 0.0 }
  0x8d   :  { %v726_v2 = vpop.permute.xlu1 %725 }
  0x8e   :  { %v716_v29 = vpop.permute.xlu0 %715 }
  0x8f   :  { %v873_v4 = vmul.f32 %v716_v29, %v297_v63 }
  0x90   :  { %v252_v11 = vpop.f32.mrf.mxu2  ;;  %v207_v9 = vpop.f32.mrf.mxu0 }
  0x91   :  { %905 = vst [vmem:[#allocation2] sm:$0xff] %v873_v4  ;;  %v208_v3 = vadd.f32 %v2071_v39, %v207_v9  ;;  %v231_v13 = vpop.f32.mrf.mxu1  ;;  %v2081_v43 = vpop.f32.mrf.mxu3  ;;  %v253_v54 = vadd.f32 %v2071_v39, %v252_v11 }
  0x92   :  { %v232_v60 = vadd.f32 %v2071_v39, %v231_v13  ;;  %v250_v13 = vadd.f32 %v2071_v39, %v2075_v61 }
  0x93   :  { %v299_v45 = vmax.f32 %v208_v3, 0.0  ;;  %v314_v16 = vmax.f32 %v253_v54, 0.0 }
  0x94   :  { %v2083_v17 = vpop.permute.xlu2 %785  ;;  %v307_v41 = vmax.f32 %v232_v60, 0.0 }
  0x95   :  { %v731_v14 = vpop.permute.xlu1 %730  ;;  %v875_v6 = vmul.f32 %v726_v2, %v299_v45 }
  0x96   :  { %v721_v18 = vpop.permute.xlu0 %720 }
  0x97   :  { %v874_v15 = vmul.f32 %v721_v18, %v298_v33  ;;  %907 = vst [vmem:[#allocation2 + $0x10] sm:$0xff] %v875_v6 }
  0x98   :  { %v2086_v21 = vpop.f32.mrf.mxu2  ;;  %v210_v19 = vpop.f32.mrf.mxu0 }
  0x99   :  { %906 = vst [vmem:[#allocation2 + $0x8] sm:$0xff] %v874_v15  ;;  %v211_v27 = vadd.f32 %v2071_v39, %v210_v19  ;;  %v234_v28 = vpop.f32.mrf.mxu1  ;;  %v279_v23 = vpop.f32.mrf.mxu3 }
  0x9a   :  { %v235_v30 = vadd.f32 %v2071_v39, %v234_v28  ;;  %v280_v2 = vadd.f32 %v2071_v39, %v279_v23 }
  0x9b   :  { %v300_v36 = vmax.f32 %v211_v27, 0.0 }
  0x9c   :  { %v801_v47 = vpop.permute.xlu2 %800  ;;  %v308_v57 = vmax.f32 %v235_v30, 0.0  ;;  %v323_v54 = vmax.f32 %v280_v2, 0.0 }
  0x9d   :  { %v890_v31 = vmul.f32 %v801_v47, %v314_v16  ;;  %v2090_v32 = vpop.permute.xlu1 %750  ;;  %v876_v35 = vmul.f32 %v731_v14, %v300_v36 }
  0x9e   :  { %v2093_v34 = vpop.permute.xlu0 %745  ;;  %v884_v1 = vmul.f32 %v771_v0, %v308_v57 }
  0x9f   :  { %922 = vst [vmem:[#allocation2 + $0x88] sm:$0xff] %v890_v31 }
  0xa0   :  { %908 = vst [vmem:[#allocation2 + $0x18] sm:$0xff] %v876_v35  ;;  %v258_v38 = vpop.f32.mrf.mxu2  ;;  %v213_v40 = vpop.f32.mrf.mxu0 }
  0xa1   :  { %916 = vst [vmem:[#allocation2 + $0x58] sm:$0xff] %v884_v1  ;;  %v214_v20 = vadd.f32 %v2071_v39, %v213_v40  ;;  %v237_v22 = vpop.f32.mrf.mxu1  ;;  %v2097_v42 = vpop.f32.mrf.mxu3  ;;  %v259_v31 = vadd.f32 %v2071_v39, %v258_v38  ;;  %v256_v40 = vadd.f32 %v2071_v39, %v2086_v21 }
  0xa2   :  { %v238_v12 = vadd.f32 %v2071_v39, %v237_v22 }
  0xa3   :  { %v301_v25 = vmax.f32 %v214_v20, 0.0  ;;  %v316_v22 = vmax.f32 %v259_v31, 0.0 }
  0xa4   :  { %v816_v37 = vpop.permute.xlu2 %815 }
  0xa5   :  { %v766_v7 = vpop.permute.xlu1 %765  ;;  %v877_v48 = vmul.f32 %v2064_v50, %v301_v25  ;;  %v309_v50 = vmax.f32 %v238_v12, 0.0 }
  0xa6   :  { %v883_v46 = vmul.f32 %v766_v7, %v307_v41 }
  0xa7   :  { %909 = vst [vmem:[#allocation2 + $0x20] sm:$0xff] %v877_v48 }
  0xa8   :  { %v761_v10 = vpop.permute.xlu0 %760  ;;  %915 = vst [vmem:[#allocation2 + $0x50] sm:$0xff] %v883_v46  ;;  %v261_v52 = vpop.f32.mrf.mxu2 }
  0xa9   :  { %v882_v49 = vmul.f32 %v761_v10, %v306_v44  ;;  %v262_v53 = vadd.f32 %v2071_v39, %v261_v52  ;;  %v216_v8 = vpop.f32.mrf.mxu0  ;;  %v240_v56 = vpop.f32.mrf.mxu1 }
  0xaa   :  { %v217_v55 = vadd.f32 %v2071_v39, %v216_v8  ;;  %v2103_v58 = vpop.f32.mrf.mxu3  ;;  %v241_v59 = vadd.f32 %v2071_v39, %v240_v56 }
  0xab   :  { %914 = vst [vmem:[#allocation2 + $0x48] sm:$0xff] %v882_v49  ;;  %v317_v62 = vmax.f32 %v262_v53, 0.0 }
  0xac   :  { %v2106_v63 = vpop.permute.xlu2 %830  ;;  %v302_v0 = vmax.f32 %v217_v55, 0.0  ;;  %v310_v5 = vmax.f32 %v241_v59, 0.0 }
  0xad   :  { %v893_v29 = vmul.f32 %v816_v37, %v317_v62  ;;  %v781_v4 = vpop.permute.xlu1 %780 }
  0xae   :  { %v878_v11 = vmul.f32 %v2066_v51, %v302_v0  ;;  %v886_v3 = vmul.f32 %v781_v4, %v310_v5  ;;  %v313_v51 = vmax.f32 %v250_v13, 0.0  ;;  %v274_v4 = vadd.f32 %v2071_v39, %v2077_v24 }
  0xaf   :  { %925 = vst [vmem:[#allocation2 + $0xa0] sm:$0xff] %v893_v29  ;;  %v277_v29 = vadd.f32 %v2071_v39, %v2081_v43  ;;  %v283_v43 = vadd.f32 %v2071_v39, %v2097_v42 }
  0xb0   :  { %v776_v9 = vpop.permute.xlu0 %775  ;;  %910 = vst [vmem:[#allocation2 + $0x28] sm:$0xff] %v878_v11  ;;  %v264_v45 = vpop.f32.mrf.mxu2 }
  0xb1   :  { %v885_v33 = vmul.f32 %v776_v9, %v309_v50  ;;  %918 = vst [vmem:[#allocation2 + $0x68] sm:$0xff] %v886_v3  ;;  %v219_v14 = vpop.f32.mrf.mxu0  ;;  %v243_v6 = vpop.f32.mrf.mxu1  ;;  %v265_v12 = vadd.f32 %v2071_v39, %v264_v45  ;;  %v322_v11 = vmax.f32 %v277_v29, 0.0  ;;  %v321_v9 = vmax.f32 %v274_v4, 0.0 }
  0xb2   :  { %v220_v18 = vadd.f32 %v2071_v39, %v219_v14  ;;  %v288_v15 = vpop.f32.mrf.mxu3  ;;  %v244_v16 = vadd.f32 %v2071_v39, %v243_v6  ;;  %v286_v45 = vadd.f32 %v2071_v39, %v2103_v58  ;;  %v324_v24 = vmax.f32 %v283_v43, 0.0 }
  0xb3   :  { %917 = vst [vmem:[#allocation2 + $0x60] sm:$0xff] %v885_v33  ;;  %v289_v61 = vadd.f32 %v2071_v39, %v288_v15  ;;  %v318_v56 = vmax.f32 %v265_v12, 0.0 }
  0xb4   :  { %v846_v19 = vpop.permute.xlu2 %845  ;;  %v303_v27 = vmax.f32 %v220_v18, 0.0  ;;  %v311_v30 = vmax.f32 %v244_v16, 0.0  ;;  %v325_v14 = vmax.f32 %v286_v45, 0.0 }
  0xb5   :  { %v899_v28 = vmul.f32 %v846_v19, %v323_v54  ;;  %v796_v23 = vpop.permute.xlu1 %795  ;;  %v326_v35 = vmax.f32 %v289_v61, 0.0 }
  0xb6   :  { %v889_v47 = vmul.f32 %v796_v23, %v313_v51  ;;  %v879_v36 = vmul.f32 %v2093_v34, %v303_v27  ;;  %v887_v60 = vmul.f32 %v2083_v17, %v311_v30  ;;  %v315_v17 = vmax.f32 %v256_v40, 0.0 }
  0xb7   :  { %931 = vst [vmem:[#allocation2 + $0xd0] sm:$0xff] %v899_v28 }
  0xb8   :  { %v791_v57 = vpop.permute.xlu0 %790  ;;  %921 = vst [vmem:[#allocation2 + $0x80] sm:$0xff] %v889_v47  ;;  %v267_v1 = vpop.f32.mrf.mxu2 }
  0xb9   :  { %911 = vst [vmem:[#allocation2 + $0x30] sm:$0xff] %v879_v36  ;;  %v222_v26 = vpop.f32.mrf.mxu0  ;;  %v246_v20 = vpop.f32.mrf.mxu1  ;;  %v268_v48 = vadd.f32 %v2071_v39, %v267_v1 }
  0xba   :  { %919 = vst [vmem:[#allocation2 + $0x70] sm:$0xff] %v887_v60  ;;  %v223_v41 = vadd.f32 %v2071_v39, %v222_v26  ;;  %v247_v34 = vadd.f32 %v2071_v39, %v246_v20  ;;  %v291_v5 = vpop.f32.mrf.mxu3 }
  0xbb   :  { %v319_v55 = vmax.f32 %v268_v48, 0.0  ;;  %v292_v19 = vadd.f32 %v2071_v39, %v291_v5 }
  0xbc   :  { %v861_v38 = vpop.permute.xlu2 %860  ;;  %v304_v44 = vmax.f32 %v223_v41, 0.0  ;;  %v312_v25 = vmax.f32 %v247_v34, 0.0 }
  0xbd   :  { %v902_v37 = vmul.f32 %v861_v38, %v326_v35  ;;  %v327_v58 = vmax.f32 %v292_v19, 0.0 }
  0xbe   :  { %v880_v46 = vmul.f32 %v2090_v32, %v304_v44  ;;  %v888_v49 = vmul.f32 %v791_v57, %v312_v25 }
  0xbf   :  { %v811_v7 = vpop.permute.xlu1 %810  ;;  %934 = vst [vmem:[#allocation2 + $0xe8] sm:$0xff] %v902_v37 }
  0xc0   :  { %v892_v10 = vmul.f32 %v811_v7, %v316_v22  ;;  %v806_v21 = vpop.permute.xlu0 %805  ;;  %912 = vst [vmem:[#allocation2 + $0x38] sm:$0xff] %v880_v46  ;;  %v270_v53 = vpop.f32.mrf.mxu2 }
  0xc1   :  { %v891_v52 = vmul.f32 %v806_v21, %v315_v17  ;;  %v271_v8 = vadd.f32 %v2071_v39, %v270_v53  ;;  %920 = vst [vmem:[#allocation2 + $0x78] sm:$0xff] %v888_v49 }
  0xc2   :  { %924 = vst [vmem:[#allocation2 + $0x98] sm:$0xff] %v892_v10  ;;  %v294_v54 = vpop.f32.mrf.mxu3 }
  0xc3   :  { %923 = vst [vmem:[#allocation2 + $0x90] sm:$0xff] %v891_v52  ;;  %v320_v62 = vmax.f32 %v271_v8, 0.0  ;;  %v295_v15 = vadd.f32 %v2071_v39, %v294_v54 }
  0xc5   :  { %v896_v32 = vmul.f32 %v2106_v63, %v320_v62  ;;  %v328_v27 = vmax.f32 %v295_v15, 0.0 }
  0xc7   :  { %v826_v59 = vpop.permute.xlu1 %825  ;;  %928 = vst [vmem:[#allocation2 + $0xb8] sm:$0xff] %v896_v32 }
  0xc8   :  { %v895_v50 = vmul.f32 %v826_v59, %v319_v55  ;;  %v821_v0 = vpop.permute.xlu0 %820 }
  0xc9   :  { %v894_v2 = vmul.f32 %v821_v0, %v318_v56 }
  0xca   :  { %927 = vst [vmem:[#allocation2 + $0xb0] sm:$0xff] %v895_v50 }
  0xcb   :  { %926 = vst [vmem:[#allocation2 + $0xa8] sm:$0xff] %v894_v2 }
  0xcf   :  { %v841_v3 = vpop.permute.xlu1 %840 }
  0xd0   :  { %v898_v13 = vmul.f32 %v841_v3, %v322_v11  ;;  %v836_v33 = vpop.permute.xlu0 %835 }
  0xd1   :  { %v897_v63 = vmul.f32 %v836_v33, %v321_v9 }
  0xd2   :  { %930 = vst [vmem:[#allocation2 + $0xc8] sm:$0xff] %v898_v13 }
  0xd3   :  { %929 = vst [vmem:[#allocation2 + $0xc0] sm:$0xff] %v897_v63 }
  0xd8   :  { %v856_v18 = vpop.permute.xlu1 %855 }
  0xd9   :  { %v901_v6 = vmul.f32 %v856_v18, %v325_v14  ;;  %v851_v16 = vpop.permute.xlu0 %850 }
  0xda   :  { %v900_v51 = vmul.f32 %v851_v16, %v324_v24 }
  0xdb   :  { %933 = vst [vmem:[#allocation2 + $0xe0] sm:$0xff] %v901_v6 }
  0xdc   :  { %932 = vst [vmem:[#allocation2 + $0xd8] sm:$0xff] %v900_v51 }
  0xe0   :  { %v871_v42 = vpop.permute.xlu1 %870 }
  0xe1   :  { %v904_v28 = vmul.f32 %v871_v42, %v328_v27  ;;  %v866_v23 = vpop.permute.xlu0 %865 }
  0xe2   :  { %v903_v30 = vmul.f32 %v866_v23, %v327_v58 }
  0xe3   :  { %936 = vst [vmem:[#allocation2 + $0xf8] sm:$0xff] %v904_v28 }
  0xe4   :  { %935 = vst [vmem:[#allocation2 + $0xf0] sm:$0xff] %v903_v30 }
  0xe5   :  { %949 = dma.vmem_to_hbm [thread:$0]  %s942_s10, 4096, %s944_s13, [#allocation3], %s1090_s14, %s1090_s14, %s1091_s15  }
  0xe6   :  { %1086 = dma.done.wait [#allocation3], 4096  }
  0xe7   :  { %1087 = vsyncadd [#allocation3], 4294963200 }
  0xe8   :  { %954 = vsyncpa [#allocation3], 1 }

</bundles_post_ra>
